<compile_context>
chip_gen: v7x
topology: tpu7x:2x2x1
jax: 0.10.0
libtpu: 0.0.40
codegen_flags: <defaults>
</compile_context>

<pallas_src>
import functools

import jax
import jax.numpy as jnp
from jax.experimental import pallas as pl
from jax.experimental.pallas import tpu as pltpu

LEAKINESS = 0.01
EPS = 1e-5  # PyTorch InstanceNorm2d default eps


# ----------------------------------------------------------------------------
# Hardware queries (safe fallbacks if the API/field is unavailable).
# ----------------------------------------------------------------------------
def _query_tpu_info():
    fn = getattr(pltpu, "get_tpu_info", None)
    if fn is None:
        return None
    try:
        return fn()
    except Exception:
        return None


def _vmem_capacity_bytes():
    info = _query_tpu_info()
    if info is not None:
        v = getattr(info, "vmem_capacity_bytes", None)
        if isinstance(v, int) and v > 0:
            return v
    return 64 * 1024 * 1024  # conservative (v7x-sized) fallback


def _num_tensorcores():
    info = _query_tpu_info()
    if info is not None:
        for attr in ("num_cores", "core_count", "num_tensorcores"):
            v = getattr(info, attr, None)
            if isinstance(v, int) and v > 0:
                return v
    return 1


# ----------------------------------------------------------------------------
# Planning: generation-aware vmem limit, residency mode, tile size, Cout blocks.
# ----------------------------------------------------------------------------
def _plan(N, Cin, Cout, HW, *, x_item, out_item, tile_hw_req, residency_req,
          cout_blocks_req):
    vmem_cap = _vmem_capacity_bytes()
    # ~108 MiB on 128-MiB parts (v5e/v6e), ~52 MiB on 64-MiB v7x.
    vmem_limit = max(16 << 20, min(int(vmem_cap * 0.85), vmem_cap - (12 << 20)))

    # Cout blocking: provides a size>=2 "parallel" grid axis so both v7x
    # TensorCores have work when the batch axis alone cannot feed them.
    if cout_blocks_req is not None:
        cb = max(1, int(cout_blocks_req))
    elif N == 1 and _num_tensorcores() >= 2:
        cb = 2
    else:
        cb = 1
    if cb > 1 and (Cout % cb != 0 or (Cout // cb) % 8 != 0):
        cb = 1  # keep (8,128) block-shape rule satisfied
    cout_blk = Cout // cb

    hw128 = ((HW + 127) // 128) * 128

    # Residency: "y" = keep per-sample conv output resident (skip 2nd x read
    # and 2nd matmul); "x" = keep input resident (skip 2nd x read only);
    # None = streaming two-phase fallback.
    y_bytes = cout_blk * hw128 * 4
    x_bytes = Cin * hw128 * x_item
    resid_budget = int(0.38 * vmem_limit)  # ~41 MiB (v5e/v6e) / ~20 MiB (v7x)
    if residency_req is not None:
        mode = None if residency_req in ("none", "stream") else residency_req
    elif y_bytes <= resid_budget:
        mode = "y"
    elif x_bytes <= resid_budget:
        mode = "x"
    else:
        mode = None
    resid_bytes = y_bytes if mode == "y" else (x_bytes if mode == "x" else 0)

    # Tile size from the remaining VMEM budget:
    # double-buffered x and out tiles + one f32 y working tile per lane.
    per_lane = 2 * Cin * x_item + 2 * cout_blk * out_item + cout_blk * 4
    param_bytes = Cout * Cin * x_item + 2 * Cout * 4
    remaining = max(0, vmem_limit - resid_bytes - param_bytes - (2 << 20))
    tile_max = max(128, (int(0.7 * remaining) // per_lane) // 128 * 128)

    if tile_hw_req is not None:
        tile = max(128, (int(tile_hw_req) // 128) * 128)
    else:
        tile = tile_max
    tile = min(tile, hw128)
    n_tiles = -(-hw128 // tile)                       # cdiv
    tile = ((-(-hw128 // n_tiles) + 127) // 128) * 128  # balance tile sizes
    hw_pad = n_tiles * tile
    return cb, cout_blk, tile, n_tiles, hw_pad, mode, vmem_limit


# ----------------------------------------------------------------------------
# Kernel factory.
# ----------------------------------------------------------------------------
def _make_kernel(true_hw, tile_hw, mode):
    """mode: 'y' (resident conv output), 'x' (resident input), None (stream)."""
    inv_hw = 1.0 / float(true_hw)

    def body(x_ref, w_ref, g_ref, be_ref, o_ref,
             res_sc, sum_sc, sumsq_sc, s_sc, t_sc):
        # x_ref:  (1, Cin, TILE_HW)      lanes = spatial positions
        # w_ref:  (Cout_blk, Cin)        1x1 conv weight block
        # g/be:   (Cout_blk, 1)          IN gamma / beta
        # o_ref:  (1, Cout_blk, TILE_HW)
        # res_sc: (Cout_blk, HW_pad) f32 or (Cin, HW_pad) x-dtype or None
        p = pl.program_id(2)            # 0 = stats pass, 1 = normalize+write
        t = pl.program_id(3)
        n_t = pl.num_programs(3)
        off = pl.multiple_of(t * tile_hw, 128)

        @pl.when(jnp.logical_and(p == 0, t == 0))
        def _():
            sum_sc[...] = jnp.zeros_like(sum_sc)
            sumsq_sc[...] = jnp.zeros_like(sumsq_sc)

        @pl.when(p == 0)
        def _():
            xv = x_ref[0]                               # (Cin, TILE_HW)
            # 1x1 conv == channel matmul on the MXU; f32 accumulation.
            # Conv bias is NOT added: instance norm removes a per-channel
            # constant exactly, and omitting it keeps zero-padded lanes at 0.
            y = jnp.dot(w_ref[...], xv, preferred_element_type=jnp.float32)
            if mode == "y":
                res_sc[:, pl.ds(off, tile_hw)] = y
            elif mode == "x":
                res_sc[:, pl.ds(off, tile_hw)] = xv
            sum_sc[...] += jnp.sum(y, axis=1, keepdims=True)
            sumsq_sc[...] += jnp.sum(y * y, axis=1, keepdims=True)

        @pl.when(jnp.logical_and(p == 0, t == n_t - 1))
        def _():
            mean = sum_sc[...] * inv_hw
            var = sumsq_sc[...] * inv_hw - mean * mean  # biased variance (f32)
            s = g_ref[...] * jax.lax.rsqrt(var + EPS)   # rsqrt -> EUP slot
            s_sc[...] = s
            t_sc[...] = be_ref[...] - mean * s          # folded shift

        @pl.when(p == 1)
        def _():
            if mode == "y":
                y = res_sc[:, pl.ds(off, tile_hw)]
            elif mode == "x":
                y = jnp.dot(w_ref[...], res_sc[:, pl.ds(off, tile_hw)],
                            preferred_element_type=jnp.float32)
            else:
                y = jnp.dot(w_ref[...], x_ref[0],
                            preferred_element_type=jnp.float32)
            out = s_sc[...] * y + t_sc[...]             # norm+affine as one FMA
            o_ref[0] = jnp.where(out >= 0, out, LEAKINESS * out).astype(o_ref.dtype)

    if mode is None:
        def kernel(x_ref, w_ref, g_ref, be_ref, o_ref,
                   sum_sc, sumsq_sc, s_sc, t_sc):
            body(x_ref, w_ref, g_ref, be_ref, o_ref,
                 None, sum_sc, sumsq_sc, s_sc, t_sc)
        return kernel
    return body


# ----------------------------------------------------------------------------
# Wrapper.
# ----------------------------------------------------------------------------
def inc_conv(x_nchw, weight, bias, gamma, beta, *, tile_hw=None, residency=None,
             cout_blocks=None, compute_dtype=None):
    """IncConv forward.

    x_nchw: (N, Cin, H, W); weight: (Cout, Cin) or (Cout, Cin, 1, 1);
    bias/gamma/beta: (Cout,).  Returns (N, Cout, H, W) in x's dtype.
    residency: None (auto) | "y" | "x" | "none".  compute_dtype=jnp.bfloat16
    halves input HBM traffic (f32 accumulation/stats kept; opt-in to preserve
    reference-level accuracy by default).
    """
    N, Cin, H, W = x_nchw.shape
    if weight.ndim == 4:
        weight = weight.reshape(weight.shape[0], weight.shape[1])
    Cout = weight.shape[0]
    HW = H * W
    out_dtype = x_nchw.dtype

    # NCHW kept: only flatten spatial dims (no HBM transpose passes).
    x = x_nchw.reshape(N, Cin, HW)
    w = weight
    if compute_dtype is not None:
        x = x.astype(compute_dtype)
        w = w.astype(compute_dtype)
    g = gamma.astype(jnp.float32).reshape(Cout, 1)
    be = beta.astype(jnp.float32).reshape(Cout, 1)
    # Conv bias is a per-channel constant -> removed exactly by instance norm;
    # it has no effect on this module's output, so it is folded away entirely.
    del bias

    cb, cout_blk, tile, n_tiles, hw_pad, mode, vmem_limit = _plan(
        N, Cin, Cout, HW,
        x_item=x.dtype.itemsize, out_item=jnp.dtype(out_dtype).itemsize,
        tile_hw_req=tile_hw, residency_req=residency,
        cout_blocks_req=cout_blocks)

    if hw_pad != HW:
        # Zero padding is stats-safe because the conv bias is folded out
        # (padded lanes contribute exactly 0 to sum/sumsq); 1/HW uses true HW.
        x = jnp.pad(x, ((0, 0), (0, 0), (0, hw_pad - HW)))

    kernel = _make_kernel(HW, tile, mode)

    if mode is None:
        x_map = lambda n, c, p, t: (n, 0, t)
    else:
        # Pin the x block during phase 1 (nothing is read from it) so no x
        # re-DMA happens at all in the residency paths.
        x_map = lambda n, c, p, t: (n, 0, t * (1 - p) + (n_tiles - 1) * p)

    scratch = []
    if mode == "y":
        scratch.append(pltpu.VMEM((cout_blk, hw_pad), jnp.float32))
    elif mode == "x":
        scratch.append(pltpu.VMEM((Cin, hw_pad), x.dtype))
    scratch += [pltpu.VMEM((cout_blk, 1), jnp.float32)] * 4  # sum, sumsq, s, t

    out = pl.pallas_call(
        kernel,
        out_shape=jax.ShapeDtypeStruct((N, Cout, hw_pad), out_dtype),
        grid_spec=pltpu.PrefetchScalarGridSpec(
            num_scalar_prefetch=0,
            grid=(N, cb, 2, n_tiles),  # (sample, cout-block, phase, HW tile)
            in_specs=[
                pl.BlockSpec((1, Cin, tile), x_map),
                pl.BlockSpec((cout_blk, Cin), lambda n, c, p, t: (c, 0)),
                pl.BlockSpec((cout_blk, 1), lambda n, c, p, t: (c, 0)),
                pl.BlockSpec((cout_blk, 1), lambda n, c, p, t: (c, 0)),
            ],
            # Output index pinned during the stats phase (p == 0): Pallas only
            # writes a block back to HBM when its block index changes between
            # consecutive grid steps, so the untouched buffer is never flushed;
            # phase 1 fully writes each block exactly once.
            # GUARD: relies on the phase/tile axes running sequentially on one
            # core ("arbitrary"); do NOT mark them core-parallel or reorder.
            out_specs=pl.BlockSpec((1, cout_blk, tile),
                                   lambda n, c, p, t: (n, c, t * p)),
            scratch_shapes=scratch,
        ),
        compiler_params=pltpu.CompilerParams(
            dimension_semantics=("parallel", "parallel", "arbitrary", "arbitrary"),
            vmem_limit_bytes=int(vmem_limit),
        ),
    )(x, w, g, be)

    if hw_pad != HW:
        out = out[:, :, :HW]
    return out.reshape(N, Cout, H, W)


# ----------------------------------------------------------------------------
# Pure-JAX reference (training-mode instance norm, as in the PyTorch module).
# ----------------------------------------------------------------------------
def reference(x_nchw, weight, bias, gamma, beta):
    y = jnp.einsum("nchw,oc->nohw", x_nchw, weight) + bias[None, :, None, None]
    mean = jnp.mean(y, axis=(2, 3), keepdims=True)
    var = jnp.mean((y - mean) ** 2, axis=(2, 3), keepdims=True)
    y_hat = (y - mean) * jax.lax.rsqrt(var + EPS)
    out = gamma[None, :, None, None] * y_hat + beta[None, :, None, None]
    return jnp.where(out >= 0, out, LEAKINESS * out)


if __name__ == "__main__":
    key = jax.random.PRNGKey(0)
    N, Cin, H, W = 2, 4, 16, 16
    Cout = 8

    k_x, k_w, k_b, k_g, k_be = jax.random.split(key, 5)
    x = jax.random.normal(k_x, (N, Cin, H, W), dtype=jnp.float32)
    weight = jax.random.normal(k_w, (Cout, Cin), dtype=jnp.float32) * 0.1
    bias = jax.random.normal(k_b, (Cout,), dtype=jnp.float32) * 0.1
    gamma = 1.0 + 0.1 * jax.random.normal(k_g, (Cout,), dtype=jnp.float32)
    beta = 0.1 * jax.random.normal(k_be, (Cout,), dtype=jnp.float32)

    ref = reference(x, weight, bias, gamma, beta)

    # 1) Auto plan: resident-y fast path (y fits VMEM), budget-derived tile.
    out_auto = inc_conv(x, weight, bias, gamma, beta)
    jax.block_until_ready(out_auto)
    assert out_auto.shape == (N, Cout, H, W)
    assert jnp.allclose(out_auto, ref, atol=1e-4, rtol=1e-4), "auto (resident-y) mismatch"

    # 2) Forced streaming two-phase multi-tile fallback.
    out_stream = inc_conv(x, weight, bias, gamma, beta, tile_hw=128, residency="none")
    jax.block_until_ready(out_stream)
    assert jnp.allclose(out_stream, ref, atol=1e-4, rtol=1e-4), "streaming mismatch"

    # 3) Forced resident-x path (input cached, matmul redone in phase 1).
    out_rx = inc_conv(x, weight, bias, gamma, beta, tile_hw=128, residency="x")
    jax.block_until_ready(out_rx)
    assert jnp.allclose(out_rx, ref, atol=1e-4, rtol=1e-4), "resident-x mismatch"

    # 4) Odd spatial size -> HW padded to a multiple of 128 (stats use true HW).
    x_odd = jax.random.normal(k_x, (N, Cin, 15, 15), dtype=jnp.float32)
    ref_odd = reference(x_odd, weight, bias, gamma, beta)
    out_odd = inc_conv(x_odd, weight, bias, gamma, beta)
    jax.block_until_ready(out_odd)
    assert jnp.allclose(out_odd, ref_odd, atol=1e-4, rtol=1e-4), "odd-HW padding mismatch"

    # 5) Cout-block axis (v7x two-TensorCore path), exercised explicitly.
    Cout2 = 16
    w2 = jax.random.normal(k_w, (Cout2, Cin), dtype=jnp.float32) * 0.1
    b2 = jax.random.normal(k_b, (Cout2,), dtype=jnp.float32) * 0.1
    g2 = 1.0 + 0.1 * jax.random.normal(k_g, (Cout2,), dtype=jnp.float32)
    be2 = 0.1 * jax.random.normal(k_be, (Cout2,), dtype=jnp.float32)
    ref_cb = reference(x, w2, b2, g2, be2)
    out_cb = inc_conv(x, w2, b2, g2, be2, cout_blocks=2)
    jax.block_until_ready(out_cb)
    assert jnp.allclose(out_cb, ref_cb, atol=1e-4, rtol=1e-4), "cout-block mismatch"

    # 6) Opt-in bf16 compute (halves input HBM traffic; f32 accumulation/stats).
    out_bf16 = inc_conv(x, weight, bias, gamma, beta, compute_dtype=jnp.bfloat16)
    jax.block_until_ready(out_bf16)
    assert jnp.allclose(out_bf16, ref, atol=7e-2, rtol=7e-2), "bf16 mismatch"

    print("KERNEL_OK")
</pallas_src>

<mosaic_0001>
module attributes {stable_mosaic.version = 11 : i64} {
  func.func @body(%arg0: i32, %arg1: i32, %arg2: i32, %arg3: i32, %arg4: memref<1x4x256xf32, #tpu.memory_space<vmem>>, %arg5: memref<8x4xf32, #tpu.memory_space<vmem>>, %arg6: memref<8x1xf32, #tpu.memory_space<vmem>>, %arg7: memref<8x1xf32, #tpu.memory_space<vmem>>, %arg8: memref<1x8x256xf32, #tpu.memory_space<vmem>>, %arg9: memref<8x256xf32, #tpu.memory_space<vmem>>, %arg10: memref<8x1xf32, #tpu.memory_space<vmem>>, %arg11: memref<8x1xf32, #tpu.memory_space<vmem>>, %arg12: memref<8x1xf32, #tpu.memory_space<vmem>>, %arg13: memref<8x1xf32, #tpu.memory_space<vmem>>) attributes {dimension_semantics = [#tpu.dimension_semantics<parallel>, #tpu.dimension_semantics<parallel>, #tpu.dimension_semantics<arbitrary>, #tpu.dimension_semantics<arbitrary>], iteration_bounds = array<i64: 2, 1, 2, 1>, scalar_prefetch = 0 : i64, scratch_operands = 5 : i64, tpu.core_type = #tpu.core_type<tc>, window_params = [{transform_indices = @transform_0, window_bounds = array<i64: 1, 4, 256>}, {transform_indices = @transform_1, window_bounds = array<i64: 8, 4>}, {transform_indices = @transform_2, window_bounds = array<i64: 8, 1>}, {transform_indices = @transform_3, window_bounds = array<i64: 8, 1>}, {transform_indices = @transform_4, window_bounds = array<i64: 1, 8, 256>}]} {
    %c256_i32 = arith.constant 256 : i32
    %0 = arith.muli %arg3, %c256_i32 : i32
    %1 = tpu.assume_multiple %0, 128 : i32
    %c0_i32 = arith.constant 0 : i32
    %2 = arith.cmpi eq, %arg2, %c0_i32 : i32
    %c0_i32_0 = arith.constant 0 : i32
    %3 = arith.cmpi eq, %arg3, %c0_i32_0 : i32
    %4 = arith.andi %2, %3 : i1
    %5 = arith.extui %4 : i1 to i32
    %c0_i32_1 = arith.constant 0 : i32
    %6 = arith.cmpi ne, %5, %c0_i32_1 : i32
    scf.if %6 {
      %cst = arith.constant 0.000000e+00 : f32
      %18 = vector.broadcast %cst : f32 to vector<8x1xf32>
      %c0 = arith.constant 0 : index
      %c0_8 = arith.constant 0 : index
      %19 = vector.load %arg10[%c0, %c0_8] : memref<8x1xf32, #tpu.memory_space<vmem>>, vector<8x1xf32>
      tpu.vector_store %arg10[%c0, %c0_8], %18 {strides = array<i32>} : memref<8x1xf32, #tpu.memory_space<vmem>>, vector<8x1xf32>,
      %cst_9 = arith.constant 0.000000e+00 : f32
      %20 = vector.broadcast %cst_9 : f32 to vector<8x1xf32>
      %c0_10 = arith.constant 0 : index
      %c0_11 = arith.constant 0 : index
      %21 = vector.load %arg11[%c0_10, %c0_11] : memref<8x1xf32, #tpu.memory_space<vmem>>, vector<8x1xf32>
      tpu.vector_store %arg11[%c0_10, %c0_11], %20 {strides = array<i32>} : memref<8x1xf32, #tpu.memory_space<vmem>>, vector<8x1xf32>,
    } else {
    }
    %c0_i32_2 = arith.constant 0 : i32
    %7 = arith.cmpi eq, %arg2, %c0_i32_2 : i32
    %8 = arith.extui %7 : i1 to i32
    %c0_i32_3 = arith.constant 0 : i32
    %9 = arith.cmpi ne, %8, %c0_i32_3 : i32
    scf.if %9 {
      %c0 = arith.constant 0 : index
      %c0_8 = arith.constant 0 : index
      %c0_9 = arith.constant 0 : index
      %18 = vector.load %arg4[%c0, %c0_8, %c0_9] : memref<1x4x256xf32, #tpu.memory_space<vmem>>, vector<1x4x256xf32>
      %19 = vector.shape_cast %18 : vector<1x4x256xf32> to vector<4x256xf32>
      %c0_10 = arith.constant 0 : index
      %c0_11 = arith.constant 0 : index
      %20 = vector.load %arg5[%c0_10, %c0_11] : memref<8x4xf32, #tpu.memory_space<vmem>>, vector<8x4xf32>
      %cst = arith.constant dense<0.000000e+00> : vector<8x256xf32>
      %21 = tpu.matmul %20, %19, %cst {dimension_numbers = #tpu.dot_dimension_numbers<[1], [0], [0], [1], [0, 0, 1, 1], [], []>} : vector<8x4xf32>, vector<4x256xf32>, vector<8x256xf32> -> vector<8x256xf32>
      %c0_12 = arith.constant 0 : index
      %22 = arith.index_cast %1 : i32 to index
      %23 = vector.load %arg9[%c0_12, %22] : memref<8x256xf32, #tpu.memory_space<vmem>>, vector<8x256xf32>
      tpu.vector_store %arg9[%c0_12, %22], %21 {strides = array<i32>} : memref<8x256xf32, #tpu.memory_space<vmem>>, vector<8x256xf32>,
      %c0_13 = arith.constant 0 : index
      %c0_14 = arith.constant 0 : index
      %24 = vector.load %arg10[%c0_13, %c0_14] : memref<8x1xf32, #tpu.memory_space<vmem>>, vector<8x1xf32>
      %cst_15 = arith.constant dense<0.000000e+00> : vector<8xf32>
      %25 = vector.multi_reduction <add>, %21, %cst_15 [1] : vector<8x256xf32> to vector<8xf32>
      %26 = vector.shape_cast %25 : vector<8xf32> to vector<8x1xf32>
      %27 = arith.addf %24, %26 : vector<8x1xf32>
      %c0_16 = arith.constant 0 : index
      %c0_17 = arith.constant 0 : index
      %28 = vector.load %arg10[%c0_16, %c0_17] : memref<8x1xf32, #tpu.memory_space<vmem>>, vector<8x1xf32>
      tpu.vector_store %arg10[%c0_16, %c0_17], %27 {strides = array<i32>} : memref<8x1xf32, #tpu.memory_space<vmem>>, vector<8x1xf32>,
      %c0_18 = arith.constant 0 : index
      %c0_19 = arith.constant 0 : index
      %29 = vector.load %arg11[%c0_18, %c0_19] : memref<8x1xf32, #tpu.memory_space<vmem>>, vector<8x1xf32>
      %30 = arith.mulf %21, %21 : vector<8x256xf32>
      %cst_20 = arith.constant dense<0.000000e+00> : vector<8xf32>
      %31 = vector.multi_reduction <add>, %30, %cst_20 [1] : vector<8x256xf32> to vector<8xf32>
      %32 = vector.shape_cast %31 : vector<8xf32> to vector<8x1xf32>
      %33 = arith.addf %29, %32 : vector<8x1xf32>
      %c0_21 = arith.constant 0 : index
      %c0_22 = arith.constant 0 : index
      %34 = vector.load %arg11[%c0_21, %c0_22] : memref<8x1xf32, #tpu.memory_space<vmem>>, vector<8x1xf32>
      tpu.vector_store %arg11[%c0_21, %c0_22], %33 {strides = array<i32>} : memref<8x1xf32, #tpu.memory_space<vmem>>, vector<8x1xf32>,
    } else {
    }
    %c0_i32_4 = arith.constant 0 : i32
    %10 = arith.cmpi eq, %arg2, %c0_i32_4 : i32
    %c0_i32_5 = arith.constant 0 : i32
    %11 = arith.cmpi eq, %arg3, %c0_i32_5 : i32
    %12 = arith.andi %10, %11 : i1
    %13 = arith.extui %12 : i1 to i32
    %c0_i32_6 = arith.constant 0 : i32
    %14 = arith.cmpi ne, %13, %c0_i32_6 : i32
    scf.if %14 {
      %c0 = arith.constant 0 : index
      %c0_8 = arith.constant 0 : index
      %18 = vector.load %arg10[%c0, %c0_8] : memref<8x1xf32, #tpu.memory_space<vmem>>, vector<8x1xf32>
      %cst = arith.constant 3.906250e-03 : f32
      %19 = vector.broadcast %cst : f32 to vector<8x1xf32>
      %20 = arith.mulf %18, %19 : vector<8x1xf32>
      %c0_9 = arith.constant 0 : index
      %c0_10 = arith.constant 0 : index
      %21 = vector.load %arg11[%c0_9, %c0_10] : memref<8x1xf32, #tpu.memory_space<vmem>>, vector<8x1xf32>
      %cst_11 = arith.constant 3.906250e-03 : f32
      %22 = vector.broadcast %cst_11 : f32 to vector<8x1xf32>
      %23 = arith.mulf %21, %22 : vector<8x1xf32>
      %24 = arith.mulf %20, %20 : vector<8x1xf32>
      %25 = arith.subf %23, %24 : vector<8x1xf32>
      %c0_12 = arith.constant 0 : index
      %c0_13 = arith.constant 0 : index
      %26 = vector.load %arg6[%c0_12, %c0_13] : memref<8x1xf32, #tpu.memory_space<vmem>>, vector<8x1xf32>
      %cst_14 = arith.constant 9.99999974E-6 : f32
      %27 = vector.broadcast %cst_14 : f32 to vector<8x1xf32>
      %28 = arith.addf %25, %27 : vector<8x1xf32>
      %29 = math.rsqrt %28 : vector<8x1xf32>
      %30 = arith.mulf %26, %29 : vector<8x1xf32>
      %c0_15 = arith.constant 0 : index
      %c0_16 = arith.constant 0 : index
      %31 = vector.load %arg12[%c0_15, %c0_16] : memref<8x1xf32, #tpu.memory_space<vmem>>, vector<8x1xf32>
      tpu.vector_store %arg12[%c0_15, %c0_16], %30 {strides = array<i32>} : memref<8x1xf32, #tpu.memory_space<vmem>>, vector<8x1xf32>,
      %c0_17 = arith.constant 0 : index
      %c0_18 = arith.constant 0 : index
      %32 = vector.load %arg7[%c0_17, %c0_18] : memref<8x1xf32, #tpu.memory_space<vmem>>, vector<8x1xf32>
      %33 = arith.mulf %20, %30 : vector<8x1xf32>
      %34 = arith.subf %32, %33 : vector<8x1xf32>
      %c0_19 = arith.constant 0 : index
      %c0_20 = arith.constant 0 : index
      %35 = vector.load %arg13[%c0_19, %c0_20] : memref<8x1xf32, #tpu.memory_space<vmem>>, vector<8x1xf32>
      tpu.vector_store %arg13[%c0_19, %c0_20], %34 {strides = array<i32>} : memref<8x1xf32, #tpu.memory_space<vmem>>, vector<8x1xf32>,
    } else {
    }
    %c1_i32 = arith.constant 1 : i32
    %15 = arith.cmpi eq, %arg2, %c1_i32 : i32
    %16 = arith.extui %15 : i1 to i32
    %c0_i32_7 = arith.constant 0 : i32
    %17 = arith.cmpi ne, %16, %c0_i32_7 : i32
    scf.if %17 {
      %c0 = arith.constant 0 : index
      %18 = arith.index_cast %1 : i32 to index
      %19 = vector.load %arg9[%c0, %18] : memref<8x256xf32, #tpu.memory_space<vmem>>, vector<8x256xf32>
      %c0_8 = arith.constant 0 : index
      %c0_9 = arith.constant 0 : index
      %20 = vector.load %arg12[%c0_8, %c0_9] : memref<8x1xf32, #tpu.memory_space<vmem>>, vector<8x1xf32>
      %21 = vector.broadcast %20 : vector<8x1xf32> to vector<8x256xf32>
      %22 = arith.mulf %21, %19 : vector<8x256xf32>
      %c0_10 = arith.constant 0 : index
      %c0_11 = arith.constant 0 : index
      %23 = vector.load %arg13[%c0_10, %c0_11] : memref<8x1xf32, #tpu.memory_space<vmem>>, vector<8x1xf32>
      %24 = vector.broadcast %23 : vector<8x1xf32> to vector<8x256xf32>
      %25 = arith.addf %22, %24 : vector<8x256xf32>
      %cst = arith.constant 0.000000e+00 : f32
      %26 = vector.broadcast %cst : f32 to vector<8x256xf32>
      %27 = arith.cmpf oge, %25, %26 : vector<8x256xf32>
      %cst_12 = arith.constant 0.00999999977 : f32
      %28 = vector.broadcast %cst_12 : f32 to vector<8x256xf32>
      %29 = arith.mulf %28, %25 : vector<8x256xf32>
      %30 = arith.select %27, %25, %29 : vector<8x256xi1>, vector<8x256xf32>
      %c0_13 = arith.constant 0 : index
      %c0_14 = arith.constant 0 : index
      %c0_15 = arith.constant 0 : index
      %31 = vector.load %arg8[%c0_13, %c0_14, %c0_15] : memref<1x8x256xf32, #tpu.memory_space<vmem>>, vector<1x8x256xf32>
      %32 = vector.shape_cast %31 : vector<1x8x256xf32> to vector<8x256xf32>
      %33 = vector.shape_cast %30 : vector<8x256xf32> to vector<1x8x256xf32>
      tpu.vector_store %arg8[%c0_13, %c0_14, %c0_15], %33 {strides = array<i32>} : memref<1x8x256xf32, #tpu.memory_space<vmem>>, vector<1x8x256xf32>,
    } else {
    }
    return
  }
  func.func @transform_0(%arg0: i32, %arg1: i32, %arg2: i32, %arg3: i32) -> (i32, i32, i32) {
    %c1_i32 = arith.constant 1 : i32
    %0 = arith.subi %c1_i32, %arg2 : i32
    %1 = arith.muli %arg3, %0 : i32
    %c0_i32 = arith.constant 0 : i32
    %2 = arith.muli %c0_i32, %arg2 : i32
    %3 = arith.addi %1, %2 : i32
    %c0_i32_0 = arith.constant 0 : i32
    %c0_i32_1 = arith.constant 0 : i32
    return %arg0, %c0_i32_0, %3 : i32, i32, i32
  }
  func.func @transform_1(%arg0: i32, %arg1: i32, %arg2: i32, %arg3: i32) -> (i32, i32) {
    %c0_i32 = arith.constant 0 : i32
    %c0_i32_0 = arith.constant 0 : i32
    return %arg1, %c0_i32 : i32, i32
  }
  func.func @transform_2(%arg0: i32, %arg1: i32, %arg2: i32, %arg3: i32) -> (i32, i32) {
    %c0_i32 = arith.constant 0 : i32
    %c0_i32_0 = arith.constant 0 : i32
    return %arg1, %c0_i32 : i32, i32
  }
  func.func @transform_3(%arg0: i32, %arg1: i32, %arg2: i32, %arg3: i32) -> (i32, i32) {
    %c0_i32 = arith.constant 0 : i32
    %c0_i32_0 = arith.constant 0 : i32
    return %arg1, %c0_i32 : i32, i32
  }
  func.func @transform_4(%arg0: i32, %arg1: i32, %arg2: i32, %arg3: i32) -> (i32, i32, i32) {
    %0 = arith.muli %arg3, %arg2 : i32
    %c0_i32 = arith.constant 0 : i32
    return %arg0, %arg1, %0 : i32, i32, i32
  }
}

</mosaic_0001>

<bundles_post_ra>
// kernel: tpu_custom_call.1
= control target key start
LH: loop header
LB: loop body
LE: loop exit
PB: predicated region body
PF: predicated region fallthrough
CT: control target
= control target key end

     0   :  { %9 = vsyncpa [#allocation8], 0  ;;  %s1016_s0 = inlined_call_operand.vmem [shape: f32[2,4,256], index: 0, kind: input, shape index: {}]   ;;  %s1017_s1 = inlined_call_operand.vmem [shape: f32[8,4], index: 1, kind: input, shape index: {}]   ;;  %s1018_s2 = inlined_call_operand.vmem [shape: f32[8,1], index: 2, kind: input, shape index: {}]   ;;  %s1019_s3 = inlined_call_operand.vmem [shape: f32[8,1], index: 3, kind: input, shape index: {}]   ;;  %s1020_s4 = inlined_call_operand.hbm [shape: f32[2,8,256], index: 4, kind: output, shape index: {}]  }
   0x1   :  { %11 = vsyncpa [#allocation8 + $0x1], 0  ;;  %s865_s15 = smov 0   ;;  %s867_s16 = smov 0  }
   0x2   :  { %s869_s17 = smov 0   ;;  %s871_s18 = smov 0  }
   0x3   :  { %s873_s19 = smov 0   ;;  %s875_s20 = smov 0  }
   0x4   :  { %s877_s21 = smov 0   ;;  %s879_s22 = smov 0  }
   0x5 LB: > { %s637_s23 = sadd.s32 4294967295, %s834_s22   ;;  %s638_s24 = sadd.s32 4294967294, %s834_s22   ;;  %s834_s22 = sphi %s879_s22, %s17_s22   ;;  %s830_s21 = sphi %s877_s21, %s1029_s21   ;;  %s826_s20 = sphi %s875_s20, %s1028_s20   ;;  %s822_s19 = sphi %s873_s19, %s1027_s19   ;;  %s818_s18 = sphi %s871_s18, %s1026_s18   ;;  %s814_s17 = sphi %s869_s17, %s1025_s17   ;;  %s810_s16 = sphi %s867_s16, %s1024_s16   ;;  %s806_s15 = sphi %s865_s15, %s1023_s15  }
   0x6   : > { %s35_s25 = sadd.s32 1, %s826_s20  ;;  %s43_s26 = sadd.s32 1, %s830_s21 }
   0x7   : > { %p37_p0 = scmp.ge.s32.totalorder %s35_s25, 2  ;;  %p176_p1 = scmp.ne.s32.totalorder %s814_s17, %s810_s16 }
   0x8   : > { %p177_p2 = scmp.eq.s32.totalorder %s637_s23, 3  ;;  %p182_p4 = scmp.ne.s32.totalorder %s810_s16, %s806_s15 }
   0x9   : > { %s1031_s25 = smov (%p37_p0, %s35_s25), 0  ;;  %s1033_s26 = smov (!%p37_p0, %s43_s26), %s830_s21 }
   0xa   : > { %p914_p3 = por %p177_p2, %p176_p1  ;;  %p45_p5 = scmp.ge.s32.totalorder %s1033_s26, 2 }
   0xb   : > { %p183_p6 = scmp.eq.s32.totalorder %s638_s24, 3  ;;  %p644_p7 = scmp.ge.s32.totalorder %s834_s22, 1 }
   0xc   : > { %p239_p8 = scmp.lt.s32.totalorder %s834_s22, 5  ;;  %s1035_s26 = smov (%p45_p5, %s1033_s26), 0 }
   0xd   : > { %p924_p9 = por %p183_p6, %p182_p4  ;;  %s159_s29 = ssub.s32 %s830_s21, %s1035_s26 }
   0xe   : > { %p240_p10 = pnand %p644_p7, %p239_p8  ;;  %s166_s30 = sadd.s32 1, %s814_s17 }
   0xf   : > { %p164_p11 = scmp.eq.s32.totalorder %s159_s29, 0  ;;  %s280_s6 = sand.u32 (!%p240_p10), 1, %s810_s16  }
  0x10   : > { %243 = sbr.rel (%p240_p10) target bundleno = 597 (0x255), region = 36  ;;  %p286_p12 = scmp.lt.s32.totalorder (!%p240_p10), %s822_s19, 1 }
  0x11   : > { %s932_s5 = scalar_select %p164_p11, %s814_s17, %s166_s30  }
  0x12   : > { %s645_s7 = sshll.u32 (!%p240_p10), %s280_s6, 4  ;;  %p312_p13 = scmp.eq.s32.totalorder (!%p240_p10), %s818_s18, 0 }
  0x13   : > { %s943_s13 = scalar_lea.vmem (!%p240_p10), [#allocation7], %s645_s7 }
  0x17   : > { %s287_s8 = scalar_select %p286_p12, %s822_s19, 1 }
  0x18   : > { %317 = sbr.rel (!%p312_p13) target bundleno = 31 (0x1f), region = 40  ;;  %vm318_vm0 = vcmask (%p312_p13), 7168   ;;  %v836_v0 = vmov (%p312_p13), 0.0  }
  0x19   : > { %s659_s9 = sshll.u32 %s287_s8, 3  ;;  %319 = vst.msk [vmem:[#allocation3] sm:$0xff] (%p312_p13), %vm318_vm0, %v836_v0  ;;  %320 = vst.msk [vmem:[#allocation4] sm:$0xff] (%p312_p13), %vm318_vm0, %v836_v0 }
  0x1a   : > { %s293_s12 = scalar_lea.vmem %s1016_s0, %s659_s9 }
  0x1f PF: > { %p649_p0 = scmp.ne.s32.totalorder %s818_s18, 0 }
  0x20   : > { %v324_v1 = vld [vmem:[%s293_s12] sm:$0xff] (!%p649_p0)  ;;  %vm332_vm1 = vcmask (!%p649_p0), 1043456   ;;  %v837_v3 = vmov (!%p649_p0), 0.0   ;;  %vm328_vm2 = vcmask (!%p649_p0), 31744   ;;  %v414_v11 = vld [vmem:[#allocation3] sm:$0xff] (!%p649_p0)  ;;  %vm419_vm3 = vcmask (!%p649_p0), 7168  }
  0x21   : > { %323 = sbr.rel (%p649_p0) target bundleno = 401 (0x191), region = 44  ;;  %v327_v2 = vcombine.high (!%p649_p0), %v324_v1, %v324_v1  ;;  %401 = vmatprep.mubr.f32.mxu0 (!%p649_p0), %v837_v3  ;;  %v325_v4 = vld [vmem:[%s1017_s1] sm:$0xff] (!%p649_p0)  ;;  %v421_v14 = vld [vmem:[#allocation4] sm:$0xff] (!%p649_p0) }
  0x23   : > { %650 = vmatprep.subr.msk.mxu0 (!%p649_p0), %vm332_vm1, %v327_v2 }
  0x24   : > { %651 = vmatpush1.msk.msra.mxu0 (!%p649_p0), %vm332_vm1, %v324_v1 }
  0x25   : > { %652 = vmatmul.mubr.msk.f32.vlgmr.msra.gmra.mrb[0].mxu0 (!%p649_p0), %vm328_vm2, %v325_v4 }
  0xf8   : > { %v403_v5 = vpop.f32.mrb[0].mxu0 }
  0xf9   : > { %412 = vst [vmem:[#allocation2] sm:$0xff] %v403_v5  ;;  %v405_v6 = vpop.f32.mrb[1].mxu0  ;;  %v422_v7 = vmul.f32 %v403_v5, %v403_v5 }
  0xfa   : > { %413 = vst [vmem:[#allocation2 + $0x8] sm:$0xff] %v405_v6  ;;  %v423_v8 = vmul.f32 %v405_v6, %v405_v6  ;;  %v415_v9 = vadd.f32 %v405_v6, %v403_v5 }
  0xfc   : > { %416 = vadd.xlane.f32.xlu0 %v415_v9  ;;  %v424_v10 = vadd.f32 %v423_v8, %v422_v7 }
 0x100   : > { %425 = vadd.xlane.f32.xlu0 %v424_v10 }
 0x189   : > { %v417_v12 = vpop.xlane.xlu0 %416 }
 0x18a   : > { %v418_v13 = vadd.f32 %v417_v12, %v414_v11 }
 0x18c   : > { %420 = vst.msk [vmem:[#allocation3] sm:$0xff] %vm419_vm3, %v418_v13 }
 0x18d   : > { %v426_v15 = vpop.xlane.xlu0 %425 }
 0x18e   : > { %v427_v16 = vadd.f32 %v426_v15, %v421_v14 }
 0x190   : > { %428 = vst.msk [vmem:[#allocation4] sm:$0xff] %vm419_vm3, %v427_v16 }
 0x191 PF: > { %430 = sbr.rel (!%p312_p13) target bundleno = 432 (0x1b0), region = 48  ;;  %v437_v24 = vld [vmem:[%s1018_s2] sm:$0xff] (%p312_p13)  ;;  %vm441_vm4 = vcmask (%p312_p13), 7168  }
 0x192   : > { %v443_v27 = vld [vmem:[%s1019_s3] sm:$0xff] (%p312_p13) }
 0x193   : > { %v431_v17 = vld [vmem:[#allocation3] sm:$0xff] (%p312_p13) }
 0x194   : > { %v432_v19 = vmul.f32 (%p312_p13), 0.00390625, %v431_v17 }
 0x196   : > { %v435_v21 = vmul.f32 (%p312_p13), %v432_v19, %v432_v19 }
 0x197   : > { %v433_v18 = vld [vmem:[#allocation4] sm:$0xff] (%p312_p13) }
 0x198   : > { %v434_v20 = vmul.f32 0.00390625, %v433_v18 }
 0x19a   : > { %v436_v22 = vsub.f32 %v434_v20, %v435_v21 }
 0x19c   : > { %v438_v23 = vadd.f32 1e-05, %v436_v22 }
 0x19e   : > { %737 = vrsqrt.f32 %v438_v23 }
 0x1a8   : > { %v738_v25 = vpop.eup %737 }
 0x1a9   : > { %v440_v26 = vmul.f32 %v738_v25, %v437_v24 }
 0x1ab   : > { %442 = vst.msk [vmem:[#allocation5] sm:$0xff] %vm441_vm4, %v440_v26  ;;  %v444_v28 = vmul.f32 %v440_v26, %v432_v19 }
 0x1ad   : > { %v445_v29 = vsub.f32 %v443_v27, %v444_v28 }
 0x1af   : > { %446 = vst.msk [vmem:[#allocation6] sm:$0xff] %vm441_vm4, %v445_v29 }
 0x1b0 PF: > { %p653_p1 = scmp.ne.s32.totalorder %s818_s18, 1 }
 0x1b1   : > { %v838_v31 = vmov (!%p653_p1), 0   ;;  %v455_v34 = vld [vmem:[#allocation2] sm:$0xff] (!%p653_p1)  ;;  %v456_v35 = vld [vmem:[#allocation2 + $0x8] sm:$0xff] (!%p653_p1) }
 0x1b2   : > { %450 = sbr.rel (%p653_p1) target bundleno = 573 (0x23d), region = 52  ;;  %v457_v30 = vld [vmem:[#allocation5] sm:$0xff] (!%p653_p1)  ;;  %739 = vset.pattern.permute.xlu0 (!%p653_p1), %v838_v31 }
 0x1b3   : > { %460 = vperm.xlu0 (!%p653_p1), %739, %v457_v30  }
 0x1b6   : > { %v465_v32 = vld [vmem:[#allocation6] sm:$0xff] (!%p653_p1) }
 0x1b7   : > { %468 = vperm.xlu0 (!%p653_p1), %739, %v465_v32  }
 0x232   : > { %v461_v33 = vpop.permute.xlu0 %460 }
 0x233   : > { %v463_v36 = vmul.f32 %v461_v33, %v455_v34  ;;  %v464_v37 = vmul.f32 %v461_v33, %v456_v35 }
 0x236   : > { %v469_v38 = vpop.permute.xlu0 %468 }
 0x237   : > { %v471_v39 = vadd.f32 %v469_v38, %v463_v36  ;;  %v472_v40 = vadd.f32 %v469_v38, %v464_v37 }
 0x239   : > { %vm473_vm5 = vcmp.ge.f32.partialorder %v471_v39, 0.0  ;;  %vm474_vm6 = vcmp.ge.f32.partialorder %v472_v40, 0.0  ;;  %v475_v41 = vmul.f32 0.01, %v471_v39  ;;  %v476_v42 = vmul.f32 0.01, %v472_v40 }
 0x23b   : > { %v477_v43 = vsel %vm473_vm5, %v471_v39, %v475_v41  ;;  %v478_v44 = vsel %vm474_vm6, %v472_v40, %v476_v42 }
 0x23c   : > { %479 = vst [vmem:[%s943_s13] sm:$0xff] %v477_v43  ;;  %480 = vst [vmem:[%s943_s13 + $0x8] sm:$0xff] %v478_v44 }
 0x23d PF: > { %s661_s18 = sshll.u32 %s822_s19, 8  ;;  %s501_s11 = sshll.u32 %s943_s13, 4  ;;  %s502_s11 = int_to_ptr.vmem [resolvable:$true] %s501_s11 }
 0x23e   : > { %s966_s10 = scalar_lea.hbm %s1020_s4, %s661_s18  ;;  %s482_s12 = scalar_lea.sflag [#allocation8], %s280_s6 }
 0x23f   : > { %s740_s14 = scalar_lea.vmem %s502_s11, 256  ;;  %s839_s23 = smov [#allocation7]  }
 0x240   : > { %p741_p2 = scmp.ne.s32.totalorder %s502_s11, %s740_s14  ;;  %s744_s24 = sshll.u32 %s839_s23, 4  ;;  %s745_s24 = int_to_ptr.vmem [resolvable:$false] %s744_s24 }
 0x241   : > { %s746_s29 = scalar_lea.vmem %s745_s24, 512  ;;  %p747_p6 = scmp.lt.s32.totalorder %s502_s11, %s745_s24 }
 0x242   : > { %p742_p4 = pnand %p741_p2, %p914_p3  ;;  %p748_p7 = scmp.lt.s32.totalorder %s746_s29, %s740_s14 }
 0x244   : > { %p743_p5 = pneg %p742_p4  ;;  %p749_p8 = por %p748_p7, %p747_p6 }
 0x246   : > { %p750_p10 = pnand %p749_p8, %p743_p5 }
 0x248   : > { %753 = shalt.err (!%p750_p10)
}
 0x249   : > { %s754_s19 = scalar_lea.hbm %s966_s10, 256  ;;  %s758_s30 = scalar_lea.hbm %s1020_s4, 512 }
 0x24a   : > { %p755_p11 = scmp.ne.s32.totalorder %s966_s10, %s754_s19  ;;  %p759_p0 = scmp.lt.u32.totalorder %s966_s10, %s1020_s4 }
 0x24b   : > { %p760_p1 = scmp.lt.u32.totalorder %s758_s30, %s754_s19  ;;  %p762_p4 = scmp.lt.u32.totalorder %s754_s19, %s966_s10 }
 0x24c   : > { %p756_p12 = pnand %p755_p11, %p914_p3 }
 0x24d   : > { %p761_p2 = por %p760_p1, %p759_p0 }
 0x24e   : > { %p757_p13 = pneg %p756_p12 }
 0x24f   : > { %p763_p5 = por %p762_p4, %p761_p2 }
 0x251   : > { %p764_p6 = pnand %p763_p5, %p757_p13 }
 0x253   : > { %767 = shalt.err (!%p764_p6)
}
 0x254   : > { %662 = dma.vmem_to_hbm [thread:$0]  (%p914_p3), %s502_s11, 256, %s966_s10, %s482_s12  }
 0x255 PF: > { %p668_p7 = scmp.ge.s32.totalorder %s834_s22, 2  ;;  %s513_s8 = sand.u32 1, %s806_s15  }
 0x256   : > { %s514_s9 = scalar_lea.sflag [#allocation8], %s513_s8 }
 0x257   : > { %p665_p8 = pnand %p668_p7, %p924_p9 }
 0x259   : > { %801 = dma.done.wait (!%p665_p8), %s514_s9, 256  }
 0x25a   : > { %803 = vsyncadd (!%p665_p8), %s514_s9, 4294967040  ;;  %s17_s22 = sadd.s32 1, %s834_s22   ;;  %s1023_s15 = smov %s810_s16 }
 0x25b   : > { %p14_p10 = scmp.ge.s32.totalorder %s17_s22, 6   ;;  %s1024_s16 = smov %s814_s17 }
 0x25c   : > { %s1025_s17 = smov %s932_s5  ;;  %s1026_s18 = smov %s826_s20 }
 0x25d   : > { %s1027_s19 = smov %s830_s21  ;;  %s1028_s20 = smov %s1031_s25 }
 0x25e   : > { %s1029_s21 = smov %s1035_s26  ;;  %16 = sbr.rel (!%p14_p10) target bundleno = 5 (0x5), region = 98 }
 0x265   :  { %519 = vsyncpa [#allocation8], 1 }
 0x266   :  { %521 = vsyncpa [#allocation8 + $0x1], 1 }

</bundles_post_ra>
